<compile_context>
chip_gen: v5e
topology: v5e:2x2
jax: 0.10.0
libtpu: 0.0.40
codegen_flags: <defaults>
</compile_context>

<pallas_src>
import math

import jax
import jax.numpy as jnp
from jax.experimental import pallas as pl
from jax.experimental.pallas import tpu as pltpu

_LANE = 128
_X_BLOCK_BYTES = 3 * 1024 * 1024  # ~3 MiB per x block (see VMEM budget note above)


def _add_pe_kernel(x_ref, pe_ref, o_ref):
    # x_ref/o_ref: (tile_b, tile_f); pe_ref: (1, tile_f) -> broadcast over batch.
    o_ref[...] = x_ref[...] + pe_ref[...]


def make_positional_encoding(d_model, max_len=5000, dtype=jnp.float32):
    """Sinusoidal table identical to the PyTorch buffer, shape (max_len, d_model).

    Build it once in the model dtype (e.g. bf16) so the forward pass never casts.
    """
    assert d_model % 2 == 0, "PositionalEncoding expects even d_model"
    position = jnp.arange(max_len, dtype=jnp.float32)[:, None]            # (L, 1)
    div_term = jnp.exp(
        jnp.arange(0, d_model, 2, dtype=jnp.float32) * (-math.log(10000.0) / d_model)
    )                                                                      # (D/2,)
    angles = position * div_term                                           # (L, D/2)
    pe = jnp.zeros((max_len, d_model), jnp.float32)
    pe = pe.at[:, 0::2].set(jnp.sin(angles))
    pe = pe.at[:, 1::2].set(jnp.cos(angles))
    return pe.astype(dtype)


def _choose_tiles(B, F, itemsize):
    """Pick (tile_b, tile_f) for the (B, F=T*D) flat view."""
    tile_b = B if B <= 8 else 8                      # full batch or 8-row sublane tiles
    if F <= _LANE:
        return tile_b, F                             # full (tiny) flat axis is legal
    # ~3 MiB x-block budget -> ~12 MiB total with double-buffered x/out (+ small pe).
    budget_elems = max(_LANE, _X_BLOCK_BYTES // (itemsize * tile_b))
    max_tile_f = max(_LANE, (budget_elems // _LANE) * _LANE)
    f_ceil = pl.cdiv(F, _LANE) * _LANE
    tile_f = min(max_tile_f, f_ceil)
    # v7x: make sure both TensorCores get work for small/streaming shapes.
    if pl.cdiv(F, tile_f) == 1 and pl.cdiv(B, tile_b) == 1 and tile_f >= 2 * _LANE:
        tile_f = pl.cdiv(tile_f, 2 * _LANE) * _LANE  # ~half, still a lane multiple
    return tile_b, tile_f


def positional_encoding(x, pe, *, donate=False):
    """x: (batch, seq, d_model); pe: (max_len, d_model) buffer -> x + pe[None, :seq, :]."""
    B, T, D = x.shape
    L, D_pe = pe.shape
    assert D_pe == D and T <= L
    if pe.dtype != x.dtype:
        # Prefer building pe in the model dtype so this is a no-op.
        pe = pe.astype(x.dtype)

    F = T * D
    x2 = x.reshape(B, F)           # free under jit (row-major contiguous)
    pe2 = pe.reshape(1, L * D)     # flat view; its first F entries == pe[:T] flattened

    tile_b, tile_f = _choose_tiles(B, F, x.dtype.itemsize)
    # Batch innermost so the pe block index is unchanged across consecutive steps
    # (revisit-skip: pe streamed from HBM once per seq tile, not once per batch tile).
    grid = (pl.cdiv(F, tile_f), pl.cdiv(B, tile_b))

    out = pl.pallas_call(
        _add_pe_kernel,
        out_shape=jax.ShapeDtypeStruct((B, F), x.dtype),
        grid_spec=pltpu.PrefetchScalarGridSpec(
            num_scalar_prefetch=0,
            grid=grid,
            in_specs=[
                pl.BlockSpec((tile_b, tile_f), lambda f, b: (b, f)),  # x tile
                pl.BlockSpec((1, tile_f), lambda f, b: (0, f)),       # pe tile
            ],
            out_specs=pl.BlockSpec((tile_b, tile_f), lambda f, b: (b, f)),
        ),
        compiler_params=pltpu.CompilerParams(
            dimension_semantics=("parallel", "parallel"),
        ),
        # Only useful if the caller actually donates x (otherwise XLA copies).
        input_output_aliases=({0: 0} if donate else {}),
    )(x2, pe2)

    return out.reshape(B, T, D)


def _reference(x, pe):
    """Plain-JAX reference matching the PyTorch forward."""
    return x + pe[None, : x.shape[1], :].astype(x.dtype)


if __name__ == "__main__":
    root = jax.random.PRNGKey(0)
    k1, k2 = jax.random.split(root)

    pe_fwd = jax.jit(positional_encoding)

    # Case 1: small shape whose flat axis (T*D = 256) is lane-aligned.
    batch, seq, d_model = 2, 8, 32
    pe_buf = make_positional_encoding(d_model, max_len=5000)
    x = jax.random.normal(k1, (batch, seq, d_model), jnp.float32)
    out = jax.block_until_ready(pe_fwd(x, pe_buf))
    ref = _reference(x, pe_buf)
    assert out.shape == x.shape
    assert jnp.allclose(out, ref, atol=1e-5, rtol=1e-5), "mismatch vs reference (case 1)"

    # Case 2: ragged flat axis (T*D = 336, not a multiple of the 128-lane tile):
    # exercises the partial tail block and verifies tail writes are masked.
    b2, t2, d2 = 3, 7, 48
    pe_buf2 = make_positional_encoding(d2, max_len=64)
    x2 = jax.random.normal(k2, (b2, t2, d2), jnp.float32)
    out2 = jax.block_until_ready(pe_fwd(x2, pe_buf2))
    ref2 = _reference(x2, pe_buf2)
    assert out2.shape == x2.shape
    assert jnp.allclose(out2, ref2, atol=1e-5, rtol=1e-5), "mismatch vs reference (case 2)"

    print("KERNEL_OK")
</pallas_src>

<mosaic_0001>
module attributes {stable_mosaic.version = 11 : i64} {
  func.func @_add_pe_kernel(%arg0: i32, %arg1: i32, %arg2: memref<2x128xf32, #tpu.memory_space<vmem>>, %arg3: memref<1x128xf32, #tpu.memory_space<vmem>>, %arg4: memref<2x128xf32, #tpu.memory_space<vmem>>) attributes {dimension_semantics = [#tpu.dimension_semantics<parallel>, #tpu.dimension_semantics<parallel>], iteration_bounds = array<i64: 2, 1>, scalar_prefetch = 0 : i64, scratch_operands = 0 : i64, tpu.core_type = #tpu.core_type<tc>, window_params = [{transform_indices = @transform_0, window_bounds = array<i64: 2, 128>}, {transform_indices = @transform_1, window_bounds = array<i64: 1, 128>}, {transform_indices = @transform_2, window_bounds = array<i64: 2, 128>}]} {
    %c0 = arith.constant 0 : index
    %c0_0 = arith.constant 0 : index
    %0 = vector.load %arg2[%c0, %c0_0] : memref<2x128xf32, #tpu.memory_space<vmem>>, vector<2x128xf32>
    %c0_1 = arith.constant 0 : index
    %c0_2 = arith.constant 0 : index
    %1 = vector.load %arg3[%c0_1, %c0_2] : memref<1x128xf32, #tpu.memory_space<vmem>>, vector<1x128xf32>
    %2 = vector.broadcast %1 : vector<1x128xf32> to vector<2x128xf32>
    %3 = arith.addf %0, %2 : vector<2x128xf32>
    %c0_3 = arith.constant 0 : index
    %c0_4 = arith.constant 0 : index
    %4 = vector.load %arg4[%c0_3, %c0_4] : memref<2x128xf32, #tpu.memory_space<vmem>>, vector<2x128xf32>
    tpu.vector_store %arg4[%c0_3, %c0_4], %3 {strides = array<i32>} : memref<2x128xf32, #tpu.memory_space<vmem>>, vector<2x128xf32>,
    return
  }
  func.func @transform_0(%arg0: i32, %arg1: i32) -> (i32, i32) {
    %c0_i32 = arith.constant 0 : i32
    return %arg1, %arg0 : i32, i32
  }
  func.func @transform_1(%arg0: i32, %arg1: i32) -> (i32, i32) {
    %c0_i32 = arith.constant 0 : i32
    %c0_i32_0 = arith.constant 0 : i32
    return %c0_i32, %arg0 : i32, i32
  }
  func.func @transform_2(%arg0: i32, %arg1: i32) -> (i32, i32) {
    %c0_i32 = arith.constant 0 : i32
    return %arg1, %arg0 : i32, i32
  }
}

</mosaic_0001>

<bundles_post_ra>
// kernel: positional_encoding.1
= control target key start
LH: loop header
LB: loop body
LE: loop exit
PB: predicated region body
PF: predicated region fallthrough
CT: control target
= control target key end

     0   :  { %s361_s9 = smov 0   ;;  %s363_s10 = smov 0   ;;  %s385_s0 = inlined_call_operand.vmem [shape: f32[2,256], index: 0, kind: input, shape index: {}]   ;;  %s386_s1 = inlined_call_operand.vmem [shape: f32[1,160000], index: 1, kind: input, shape index: {}]   ;;  %s387_s2 = inlined_call_operand.vmem [shape: f32[2,256], index: 2, kind: output, shape index: {}]  }
   0x1   :  { %s365_s11 = smov 0  }
   0x2 LB: > { %s24_s12 = sadd.s32 1, %s340_s10  ;;  %p292_p0 = scmp.ge.s32.totalorder %s344_s11, 1  ;;  %s344_s11 = sphi %s365_s11, %s12_s11   ;;  %s340_s10 = sphi %s363_s10, %s389_s10   ;;  %s336_s9 = sphi %s361_s9, %s388_s9  }
   0x3   : > { %p26_p1 = scmp.ge.s32.totalorder %s24_s12, 2  ;;  %p139_p2 = scmp.lt.s32.totalorder %s344_s11, 3 }
   0x5   : > { %s391_s12 = smov (%p26_p1, %s24_s12), 0  ;;  %p140_p3 = pnand %p292_p0, %p139_p2 }
   0x6   : > { %p172_p4 = scmp.lt.s32.totalorder (!%p140_p3), %s336_s9, 1  ;;  %p178_p5 = scmp.lt.s32.totalorder (!%p140_p3), %s336_s9, 1249 }
   0x7   : > { %143 = sbr.rel (%p140_p3) target bundleno = 20 (0x14), region = 28 }
   0xc   : > { %s173_s13 = scalar_select %p172_p4, %s336_s9, 1 }
   0xd   : > { %s393_s9 = smov (!%p178_p5, %s336_s9), 1249 }
   0xe   : > { %s293_s14 = sshll.u32 %s173_s13, 1  ;;  %s180_s20 = scalar_lea.vmem %s386_s1, %s393_s9 }
   0xf   : > { %s177_s17 = scalar_lea.vmem %s385_s0, %s293_s14  ;;  %v321_v1 = vld [vmem:[%s180_s20] ss:$0 sm:$0xff]  ;;  %s188_s23 = scalar_lea.vmem %s387_s2, %s293_s14 }
  0x10   : > { %v189_v0 = vld [vmem:[%s177_s17] sm:$0x3] }
  0x11   : > { %v194_v2 = vadd.f32 %v321_v1, %v189_v0 }
  0x13   : > { %195 = vst [vmem:[%s188_s23] sm:$0x3] %v194_v2 }
  0x14 PF: > { %s12_s11 = sadd.s32 1, %s344_s11   ;;  %s388_s9 = smov %s340_s10 }
  0x15   : > { %p9_p6 = scmp.ge.s32.totalorder %s12_s11, 4   ;;  %s389_s10 = smov %s391_s12 }
  0x17   :  { %11 = sbr.rel (!%p9_p6) target bundleno = 2 (0x2), region = 61 }

</bundles_post_ra>
